<compile_context>
chip_gen: v6e
topology: v6e:2x2x1
jax: 0.10.0
libtpu: 0.0.40
codegen_flags: <defaults>
</compile_context>

<pallas_src>
import jax
import jax.numpy as jnp
from jax.experimental import pallas as pl
from jax.experimental.pallas import tpu as pltpu

_N_PAD = 128  # lane-dense output width (true logical output width is 2)


def _round_up(x: int, m: int) -> int:
    return ((x + m - 1) // m) * m


def fuse_pooler_answer_class_params(w0, b0, w1):
    """Fold dense_0 and dense_1 into a single affine map, lane-padded to 128.

    w0: (H//2, H)   PyTorch nn.Linear weight layout
    b0: (H//2,)
    w1: (2, H//2)   PyTorch nn.Linear weight layout (no bias)

    Returns:
      w_fused: (H, 128)  f32, columns [0:2] hold the real weights, rest zero
      b_fused: (1, 128)  f32, columns [0:2] hold the real bias,   rest zero
    """
    w0f = w0.astype(jnp.float32)
    b0f = b0.astype(jnp.float32)
    w1f = w1.astype(jnp.float32)
    w2 = jnp.transpose(w0f) @ jnp.transpose(w1f)   # (H, 2)
    b2 = b0f @ jnp.transpose(w1f)                  # (2,)
    H = w2.shape[0]
    w_fused = jnp.zeros((H, _N_PAD), jnp.float32).at[:, :2].set(w2)
    b_fused = jnp.zeros((1, _N_PAD), jnp.float32).at[0, :2].set(b2)
    return w_fused, b_fused


def _pooler_answer_class_kernel(x_ref, w_ref, b_ref, o_ref):
    # x_ref: (TB, H)      VMEM, native activation dtype (bf16/f32), streamed
    # w_ref: (H, 128)     VMEM, fused weight in activation dtype, resident
    # b_ref: (1, 128)     VMEM, fused bias, f32, resident
    # o_ref: (TB, 128)    VMEM, lane-dense output tile
    acc = jnp.dot(x_ref[...], w_ref[...], preferred_element_type=jnp.float32)
    # NOTE: the PyTorch forward does NOT apply tanh, so neither do we.
    o_ref[...] = (acc + b_ref[...]).astype(o_ref.dtype)


def _choose_block_b(B: int, H: int, itemsize: int) -> int:
    """Batch tile from a VMEM budget, valid across v5e/v6e/v7x."""
    sublane = max(8, 32 // itemsize)          # 8 for f32, 16 for bf16
    x_budget = 32 << 20                        # double-buffered (tb, H) x tiles
    tb = x_budget // (2 * H * itemsize)
    tb = max(sublane, (tb // sublane) * sublane)
    tb = min(tb, 4096)
    # Ensure >=2 grid steps when B allows, so v7x's two TCs both get work.
    if B > 2 * sublane and tb >= B:
        tb = _round_up((B + 1) // 2, sublane)
    tb = min(tb, _round_up(max(B, 1), sublane))
    return tb


def pooler_answer_class(cls_token_state, w_fused, b_fused):
    """cls_token_state: (B, H), any float dtype (bf16 recommended)
       w_fused: (H, 128) f32   (from fuse_pooler_answer_class_params)
       b_fused: (1, 128) f32
       returns: (B, 2) in cls_token_state.dtype
    """
    B, H = cls_token_state.shape
    assert w_fused.shape == (H, _N_PAD)
    assert b_fused.shape == (1, _N_PAD)

    x = cls_token_state                         # native dtype, no upcast copy
    in_dtype = x.dtype
    itemsize = jnp.dtype(in_dtype).itemsize
    w = w_fused.astype(in_dtype)                # tiny (H, 128), one-time cast
    b = b_fused.astype(jnp.float32)

    tb = _choose_block_b(B, H, itemsize)
    grid = (pl.cdiv(B, tb),)

    out_itemsize = itemsize
    # Explicit VMEM budget: x double-buffer + resident weight/bias + out tiles.
    vmem_bytes = (2 * tb * H * itemsize
                  + 2 * H * _N_PAD * itemsize
                  + 2 * _N_PAD * 4
                  + 2 * tb * _N_PAD * out_itemsize)
    vmem_limit = min(56 << 20, max((vmem_bytes * 5) // 4, 4 << 20))

    cost = pl.CostEstimate(
        flops=2 * B * H * _N_PAD,
        transcendentals=0,
        bytes_accessed=(B * H * itemsize + H * _N_PAD * itemsize
                        + _N_PAD * 4 + B * _N_PAD * out_itemsize),
    )

    out = pl.pallas_call(
        _pooler_answer_class_kernel,
        out_shape=jax.ShapeDtypeStruct((B, _N_PAD), in_dtype),
        grid_spec=pltpu.PrefetchScalarGridSpec(
            num_scalar_prefetch=0,
            grid=grid,
            in_specs=[
                pl.BlockSpec((tb, H), lambda i: (i, 0)),       # streamed x
                pl.BlockSpec((H, _N_PAD), lambda i: (0, 0)),   # resident weight
                pl.BlockSpec((1, _N_PAD), lambda i: (0, 0)),   # resident bias
            ],
            out_specs=pl.BlockSpec((tb, _N_PAD), lambda i: (i, 0)),
        ),
        compiler_params=pltpu.CompilerParams(
            dimension_semantics=("parallel",),
            vmem_limit_bytes=int(vmem_limit),
        ),
        cost_estimate=cost,
    )(x, w, b)

    # Keep only the 2 real output columns (tiny slice; kernel stores stay
    # lane-dense / unmasked).
    return out[:, :2]


def pooler_answer_class_ref(cls_token_state, w0, b0, w1):
    """Pure-JAX reference mirroring the PyTorch forward (two matmuls)."""
    x = cls_token_state @ w0.T + b0
    x = x @ w1.T
    return x  # squeeze(-1) is a no-op for last dim == 2


if __name__ == "__main__":
    key = jax.random.PRNGKey(0)
    B, H = 2, 32
    H2 = H // 2

    k_x, k_w0, k_b0, k_w1 = jax.random.split(key, 4)
    cls_token_state = jax.random.normal(k_x, (B, H), dtype=jnp.float32)
    # Deterministic synthetic parameters (shapes follow nn.Linear layout).
    w0 = jax.random.normal(k_w0, (H2, H), dtype=jnp.float32) * 0.05
    b0 = jax.random.normal(k_b0, (H2,), dtype=jnp.float32) * 0.05
    w1 = jax.random.normal(k_w1, (2, H2), dtype=jnp.float32) * 0.05

    # One-time weight fusion (constant-folded under jit for fixed weights).
    w_fused, b_fused = fuse_pooler_answer_class_params(w0, b0, w1)

    # f32 path (matches the PyTorch reference numerically).
    out = pooler_answer_class(cls_token_state, w_fused, b_fused)
    out = jax.block_until_ready(out)
    ref = pooler_answer_class_ref(cls_token_state, w0, b0, w1)
    assert out.shape == (B, 2), out.shape
    # Fusion changes f32 accumulation order slightly vs the two-matmul ref.
    assert jnp.allclose(out, ref, atol=1e-4, rtol=1e-4), (out, ref)

    # bf16 path (native-dtype streaming, f32 accumulation) — smoke test.
    out_bf16 = pooler_answer_class(cls_token_state.astype(jnp.bfloat16),
                                   w_fused, b_fused)
    out_bf16 = jax.block_until_ready(out_bf16)
    assert out_bf16.shape == (B, 2), out_bf16.shape
    assert bool(jnp.all(jnp.isfinite(out_bf16.astype(jnp.float32))))

    print("KERNEL_OK")
</pallas_src>

<mosaic_0001>
module attributes {stable_mosaic.version = 11 : i64} {
  func.func @_pooler_answer_class_kernel(%arg0: i32, %arg1: memref<8x32xf32, #tpu.memory_space<vmem>>, %arg2: memref<32x128xf32, #tpu.memory_space<vmem>>, %arg3: memref<1x128xf32, #tpu.memory_space<vmem>>, %arg4: memref<8x128xf32, #tpu.memory_space<vmem>>) attributes {dimension_semantics = [#tpu.dimension_semantics<parallel>], iteration_bounds = array<i64: 1>, scalar_prefetch = 0 : i64, scratch_operands = 0 : i64, tpu.core_type = #tpu.core_type<tc>, window_params = [{transform_indices = @transform_0, window_bounds = array<i64: 8, 32>}, {pipeline_mode = #tpu.pipeline_mode<synchronous>, transform_indices = @transform_1, window_bounds = array<i64: 32, 128>}, {pipeline_mode = #tpu.pipeline_mode<synchronous>, transform_indices = @transform_2, window_bounds = array<i64: 1, 128>}, {transform_indices = @transform_3, window_bounds = array<i64: 8, 128>}]} {
    %c0 = arith.constant 0 : index
    %c0_0 = arith.constant 0 : index
    %0 = vector.load %arg1[%c0, %c0_0] : memref<8x32xf32, #tpu.memory_space<vmem>>, vector<8x32xf32>
    %c0_1 = arith.constant 0 : index
    %c0_2 = arith.constant 0 : index
    %1 = vector.load %arg2[%c0_1, %c0_2] : memref<32x128xf32, #tpu.memory_space<vmem>>, vector<32x128xf32>
    %cst = arith.constant dense<0.000000e+00> : vector<8x128xf32>
    %2 = tpu.matmul %0, %1, %cst {dimension_numbers = #tpu.dot_dimension_numbers<[1], [0], [0], [1], [0, 0, 1, 1], [], []>} : vector<8x32xf32>, vector<32x128xf32>, vector<8x128xf32> -> vector<8x128xf32>
    %c0_3 = arith.constant 0 : index
    %c0_4 = arith.constant 0 : index
    %3 = vector.load %arg3[%c0_3, %c0_4] : memref<1x128xf32, #tpu.memory_space<vmem>>, vector<1x128xf32>
    %4 = vector.broadcast %3 : vector<1x128xf32> to vector<8x128xf32>
    %5 = arith.addf %2, %4 : vector<8x128xf32>
    %c0_5 = arith.constant 0 : index
    %c0_6 = arith.constant 0 : index
    %6 = vector.load %arg4[%c0_5, %c0_6] : memref<8x128xf32, #tpu.memory_space<vmem>>, vector<8x128xf32>
    tpu.vector_store %arg4[%c0_5, %c0_6], %5 {strides = array<i32>} : memref<8x128xf32, #tpu.memory_space<vmem>>, vector<8x128xf32>,
    return
  }
  func.func @transform_0(%arg0: i32) -> (i32, i32) {
    %c0_i32 = arith.constant 0 : i32
    %c0_i32_0 = arith.constant 0 : i32
    return %arg0, %c0_i32 : i32, i32
  }
  func.func @transform_1(%arg0: i32) -> (i32, i32) {
    %c0_i32 = arith.constant 0 : i32
    %c0_i32_0 = arith.constant 0 : i32
    %c0_i32_1 = arith.constant 0 : i32
    return %c0_i32, %c0_i32_0 : i32, i32
  }
  func.func @transform_2(%arg0: i32) -> (i32, i32) {
    %c0_i32 = arith.constant 0 : i32
    %c0_i32_0 = arith.constant 0 : i32
    %c0_i32_1 = arith.constant 0 : i32
    return %c0_i32, %c0_i32_0 : i32, i32
  }
  func.func @transform_3(%arg0: i32) -> (i32, i32) {
    %c0_i32 = arith.constant 0 : i32
    %c0_i32_0 = arith.constant 0 : i32
    return %arg0, %c0_i32 : i32, i32
  }
}

</mosaic_0001>

<bundles_post_ra>
// kernel: tpu_custom_call.1
= control target key start
LH: loop header
LB: loop body
LE: loop exit
PB: predicated region body
PF: predicated region fallthrough
CT: control target
= control target key end

     0   :  { %8 = vsyncpa [#allocation3], 0  ;;  %s288_s0 = inlined_call_operand.hbm [shape: f32[2,32], index: 0, kind: input, shape index: {}]   ;;  %s289_s1 = inlined_call_operand.hbm [shape: f32[32,128], index: 1, kind: input, shape index: {}]   ;;  %s290_s2 = inlined_call_operand.vmem [shape: f32[1,128], index: 2, kind: input, shape index: {}]   ;;  %s291_s3 = inlined_call_operand.hbm [shape: f32[2,128], index: 3, kind: output, shape index: {}]  }
   0x1   :  { %9 = vsyncpa [#allocation6], 0 }
   0x2   :  { %10 = vsyncpa [#allocation4], 0 }
   0x3   :  { %15 = vsyncadd [#allocation3], 96  ;;  %s241_s12 = smov [#allocation2]  }
   0x4   :  { %s16_s13 = sshll.u32 %s241_s12, 4  ;;  %s17_s13 = int_to_ptr.vmem [resolvable:$true] %s16_s13 }
   0x5   :  { %s183_s14 = scalar_lea.vmem %s17_s13, 32  ;;  %s187_s15 = scalar_lea.vmem %s17_s13, 128 }
   0x6   :  { %p184_p0 = scmp.ne.s32.totalorder %s17_s13, %s183_s14  ;;  %p188_p1 = scmp.lt.s32.totalorder %s17_s13, %s17_s13 }
   0x7   :  { %p189_p2 = scmp.lt.s32.totalorder %s187_s15, %s183_s14 }
   0x9   :  { %p190_p3 = por %p189_p2, %p188_p1 }
   0xb   :  { %p191_p4 = pnand %p190_p3, %p184_p0 }
   0xd   :  { %194 = shalt.err (!%p191_p4)
}
   0xe   :  { %s242_s16 = smov 32   ;;  %s243_s17 = smov 2  }
   0xf   :  { %22 = dma.hbm_to_vmem [thread:$0]  %s288_s0, 32, %s17_s13, [#allocation3], %s242_s16, %s242_s16, %s243_s17  }
  0x10   :  { %s244_s20 = smov [#allocation5]  }
  0x11   :  { %s28_s21 = sshll.u32 %s244_s20, 4  ;;  %s29_s21 = int_to_ptr.vmem [resolvable:$true] %s28_s21 }
  0x12   :  { %s203_s22 = scalar_lea.vmem %s29_s21, 512  ;;  %p208_p6 = scmp.lt.s32.totalorder %s29_s21, %s29_s21 }
  0x13   :  { %p204_p5 = scmp.ne.s32.totalorder %s29_s21, %s203_s22  ;;  %p209_p7 = scmp.lt.s32.totalorder %s203_s22, %s203_s22 }
  0x15   :  { %p210_p8 = por %p209_p7, %p208_p6 }
  0x17   :  { %p211_p9 = pnand %p210_p8, %p204_p5 }
  0x19   :  { %214 = shalt.err (!%p211_p9)
}
  0x1a   :  { %s245_s23 = smov 128   ;;  %s246_s24 = smov 8  }
  0x1b   :  { %34 = dma.hbm_to_vmem [thread:$0]  %s289_s1, 512, %s29_s21, [#allocation6], %s245_s23, %s245_s23, %s246_s24  }
  0x1c   :  { %235 = dma.done.wait [#allocation3], 128  }
  0x1d   :  { %236 = vsyncadd [#allocation3], 4294967168 }
  0x1e   :  { %237 = dma.done.wait [#allocation6], 512  }
  0x1f   :  { %238 = vsyncadd [#allocation6], 4294966784  ;;  %v247_v0 = vmov 0.0   ;;  %vm248_vm0 = vmmov 0   ;;  %v47_v1 = vld [vmem:[#allocation5 + $0x18] sm:$0xff]  ;;  %v46_v2 = vld [vmem:[#allocation5 + $0x10] sm:$0xff] }
  0x20   :  { %155 = vmatprep.subr.mxu0 %v247_v0  ;;  %163 = vmatprep.mubr.msk.f32.mxu0 %vm248_vm0, %v247_v0  ;;  %v45_v3 = vld [vmem:[#allocation5 + $0x8] sm:$0xff]  ;;  %v44_v4 = vld [vmem:[#allocation5] sm:$0xff]  ;;  %v43_v5 = vld [vmem:[#allocation2] sm:$0xff]  ;;  %vm55_vm1 = vcmask 261120  }
  0x21   :  { %156 = vmatpush3.msra.mxu0 %v47_v1  ;;  %v148_v6 = vld [vmem:[%s290_s2] ss:$0 sm:$0xff] }
  0x22   :  { %157 = vmatprep.subr.mxu0 %v247_v0 }
  0x23   :  { %158 = vmatpush3.msra.mxu0 %v46_v2 }
  0x24   :  { %159 = vmatprep.subr.mxu0 %v247_v0 }
  0x25   :  { %160 = vmatpush3.msra.mxu0 %v45_v3 }
  0x26   :  { %161 = vmatprep.subr.mxu0 %v247_v0 }
  0x27   :  { %162 = vmatpush3.msra.mxu0 %v44_v4 }
  0x28   :  { %164 = vmatmul.mubr.msk.f32.vlgmr.msra.gmra.mxu0 %vm55_vm1, %v43_v5 }
  0xe8   :  { %v125_v7 = vpop.f32.mrf.mxu0 }
  0xe9   :  { %v126_v8 = vadd.f32 %v148_v6, %v125_v7 }
  0xea   :  { %v165_v9 = vpop.f32.mrf.mxu0 }
  0xeb   :  { %129 = vst [vmem:[#allocation7] sm:$0xff] %v126_v8 }
  0xec   :  { %134 = vsyncadd [#allocation4], 96  ;;  %s249_s27 = smov [#allocation7]  }
  0xed   :  { %s135_s28 = sshll.u32 %s249_s27, 4  ;;  %s136_s28 = int_to_ptr.vmem [resolvable:$true] %s135_s28 }
  0xee   :  { %s215_s29 = scalar_lea.vmem %s136_s28, 32  ;;  %s219_s30 = scalar_lea.vmem %s136_s28, 128 }
  0xef   :  { %p216_p10 = scmp.ne.s32.totalorder %s136_s28, %s215_s29  ;;  %p220_p11 = scmp.lt.s32.totalorder %s136_s28, %s136_s28 }
  0xf0   :  { %p221_p12 = scmp.lt.s32.totalorder %s219_s30, %s215_s29 }
  0xf2   :  { %p222_p13 = por %p221_p12, %p220_p11 }
  0xf4   :  { %p223_p0 = pnand %p222_p13, %p216_p10 }
  0xf6   :  { %226 = shalt.err (!%p223_p0)
}
  0xf7   :  { %141 = dma.vmem_to_hbm [thread:$0]  %s136_s28, 32, %s291_s3, [#allocation4], %s242_s16, %s242_s16, %s243_s17  }
  0xf8   :  { %239 = dma.done.wait [#allocation4], 128  }
  0xf9   :  { %240 = vsyncadd [#allocation4], 4294967168 }
  0xfa   :  { %145 = vsyncpa [#allocation3], 1 }
  0xfb   :  { %146 = vsyncpa [#allocation6], 1 }
  0xfc   :  { %147 = vsyncpa [#allocation4], 1 }

</bundles_post_ra>
